<compile_context>
chip_gen: v7x
topology: tpu7x:2x2x1
jax: 0.10.0
libtpu: 0.0.40
codegen_flags: <defaults>
</compile_context>

<pallas_src>
import jax
import jax.numpy as jnp
from jax.experimental import pallas as pl
from jax.experimental.pallas import tpu as pltpu

INPUT_DIM = 561
HID1 = 128
HID2 = 64
NCLASS = 6

HID2_PAD = 128   # 64 -> 128 lanes (zero-padded, resident weights only)
OUT_PAD = 128    # 6  -> 128 lanes inside the kernel (zero-padded weights/bias)


def _round_up(n, m):
    return ((n + m - 1) // m) * m


def harfnn_kernel(x_ref, w1_ref, b1_ref, w2_ref, b2_ref, w3_ref, b3_ref, o_ref):
    # x_ref: (TB, 561) f32 | weights: compute dtype | biases: f32 | o_ref: (TB, 6) f32
    cd = w1_ref.dtype
    x = x_ref[...].astype(cd)            # cast in-kernel (no-op when cd == f32)

    # Layer 1: Linear(561 -> 128) + ReLU   (Dropout = identity at inference)
    h1 = jnp.dot(x, w1_ref[...], preferred_element_type=jnp.float32)
    h1 = jnp.maximum(h1 + b1_ref[...], 0.0)

    # Layer 2: Linear(128 -> 64) + ReLU, padded to 128 lanes (zeros are inert)
    h2 = jnp.dot(h1.astype(cd), w2_ref[...], preferred_element_type=jnp.float32)
    h2 = jnp.maximum(h2 + b2_ref[...], 0.0)

    # Layer 3: Linear(64 -> 6) logits, computed into 128 lanes, stored as 6
    out = jnp.dot(h2.astype(cd), w3_ref[...], preferred_element_type=jnp.float32)
    out = out + b3_ref[...]
    o_ref[...] = out[:, :NCLASS].astype(o_ref.dtype)


def prepare_params(params, compute_dtype=jnp.float32):
    """One-time padding/cast of weights (hoisted out of the per-call path)."""
    w1 = params["w1"].astype(compute_dtype)                               # (561, 128)
    b1 = params["b1"].reshape(1, HID1).astype(jnp.float32)

    w2 = jnp.zeros((HID1, HID2_PAD), compute_dtype)
    w2 = w2.at[:, :HID2].set(params["w2"].astype(compute_dtype))
    b2 = jnp.zeros((1, HID2_PAD), jnp.float32)
    b2 = b2.at[:, :HID2].set(params["b2"].reshape(1, HID2).astype(jnp.float32))

    w3 = jnp.zeros((HID2_PAD, OUT_PAD), compute_dtype)
    w3 = w3.at[:HID2, :NCLASS].set(params["w3"].astype(compute_dtype))
    b3 = jnp.zeros((1, OUT_PAD), jnp.float32)
    b3 = b3.at[:, :NCLASS].set(params["b3"].reshape(1, NCLASS).astype(jnp.float32))

    return dict(w1=w1, b1=b1, w2=w2, b2=b2, w3=w3, b3=b3)


def harfnn_forward(x, prepared, *, batch_tile=1024):
    """x: (B, 561) float32. prepared: output of prepare_params. Returns (B, 6) f32."""
    B = x.shape[0]
    compute_dtype = prepared["w1"].dtype
    granule = 16 if compute_dtype == jnp.bfloat16 else 8   # sublane packing granule

    # Batch tile: large (amortizes per-step overhead, long contiguous DMAs),
    # but capped so the grid keeps >= 2 parallel steps when the batch allows
    # it (megacore sharding on v7x), and single-trip-sized for tiny batches.
    b_min = _round_up(max(B, 1), granule)
    half = max(_round_up(pl.cdiv(b_min, 2), granule), granule)
    tb = min(batch_tile, b_min, half)
    b_pad = _round_up(B, tb)
    grid = (b_pad // tb,)

    # Only pad the batch axis (cheap, rows of raw f32 x); no K-pad, no cast copy.
    x_in = x if b_pad == B else jnp.pad(x, ((0, b_pad - B), (0, 0)))

    w1, b1 = prepared["w1"], prepared["b1"]
    w2, b2 = prepared["w2"], prepared["b2"]
    w3, b3 = prepared["w3"], prepared["b3"]

    # Advisory cost estimate for XLA's scheduler.
    flops = 2 * b_pad * (INPUT_DIM * HID1 + HID1 * HID2_PAD + HID2_PAD * OUT_PAD)
    bytes_accessed = (
        b_pad * INPUT_DIM * x.dtype.itemsize
        + sum(a.size * a.dtype.itemsize for a in (w1, w2, w3, b1, b2, b3))
        + b_pad * NCLASS * 4
    )

    # Weights/biases: full-array block, constant index_map -> VMEM-resident.
    resident = lambda a: pl.BlockSpec(a.shape, lambda i: (0,) * a.ndim)

    out = pl.pallas_call(
        harfnn_kernel,
        out_shape=jax.ShapeDtypeStruct((b_pad, NCLASS), jnp.float32),
        grid=grid,
        in_specs=[
            pl.BlockSpec((tb, INPUT_DIM), lambda i: (i, 0)),   # x tiles, pipelined
            resident(w1), resident(b1),
            resident(w2), resident(b2),
            resident(w3), resident(b3),
        ],
        out_specs=pl.BlockSpec((tb, NCLASS), lambda i: (i, 0)),  # compact (tb, 6) write
        compiler_params=pltpu.CompilerParams(
            dimension_semantics=("parallel",),                   # megacore on v7x
        ),
        cost_estimate=pl.CostEstimate(
            flops=flops, transcendentals=0, bytes_accessed=bytes_accessed),
    )(x_in, w1, b1, w2, b2, w3, b3)

    return out if b_pad == B else out[:B]


def init_params(key, input_dim=INPUT_DIM, nclass=NCLASS):
    """Deterministic synthetic init (PyTorch-like uniform fan-in scaling)."""
    dims = [(input_dim, HID1), (HID1, HID2), (HID2, nclass)]
    params = {}
    for i, (fan_in, fan_out) in enumerate(dims, start=1):
        key, kw, kb = jax.random.split(key, 3)
        bound = 1.0 / jnp.sqrt(fan_in)
        params[f"w{i}"] = jax.random.uniform(
            kw, (fan_in, fan_out), jnp.float32, -bound, bound)
        params[f"b{i}"] = jax.random.uniform(
            kb, (1, fan_out), jnp.float32, -bound, bound)
    return params


def harfnn_reference(x, params):
    """Pure-JAX f32 reference (original module semantics, dropout = identity)."""
    h1 = jnp.maximum(jnp.dot(x, params["w1"]) + params["b1"], 0.0)
    h2 = jnp.maximum(jnp.dot(h1, params["w2"]) + params["b2"], 0.0)
    return jnp.dot(h2, params["w3"]) + params["b3"]


if __name__ == "__main__":
    key = jax.random.PRNGKey(0)
    key, kx = jax.random.split(key)

    B = 8
    x = jax.random.normal(kx, (B, INPUT_DIM), jnp.float32)
    params = init_params(key)

    # One-time weight prep (padding/cast hoisted out of the per-call path).
    prepared = prepare_params(params, compute_dtype=jnp.float32)

    fwd = jax.jit(harfnn_forward)
    out = jax.block_until_ready(fwd(x, prepared))
    assert out.shape == (B, NCLASS), out.shape

    ref = harfnn_reference(x, params)
    assert jnp.allclose(out, ref, atol=1e-2, rtol=1e-2), \
        "mismatch vs f32 JAX reference"

    print("KERNEL_OK")
</pallas_src>

<mosaic_0001>
module attributes {stable_mosaic.version = 11 : i64} {
  func.func @harfnn_kernel(%arg0: i32, %arg1: memref<8x561xf32, #tpu.memory_space<vmem>>, %arg2: memref<561x128xf32, #tpu.memory_space<vmem>>, %arg3: memref<1x128xf32, #tpu.memory_space<vmem>>, %arg4: memref<128x128xf32, #tpu.memory_space<vmem>>, %arg5: memref<1x128xf32, #tpu.memory_space<vmem>>, %arg6: memref<128x128xf32, #tpu.memory_space<vmem>>, %arg7: memref<1x128xf32, #tpu.memory_space<vmem>>, %arg8: memref<8x6xf32, #tpu.memory_space<vmem>>) attributes {dimension_semantics = [#tpu.dimension_semantics<parallel>], iteration_bounds = array<i64: 1>, scalar_prefetch = 0 : i64, scratch_operands = 0 : i64, tpu.core_type = #tpu.core_type<tc>, window_params = [{transform_indices = @transform_0, window_bounds = array<i64: 8, 561>}, {pipeline_mode = #tpu.pipeline_mode<synchronous>, transform_indices = @transform_1, window_bounds = array<i64: 561, 128>}, {pipeline_mode = #tpu.pipeline_mode<synchronous>, transform_indices = @transform_2, window_bounds = array<i64: 1, 128>}, {pipeline_mode = #tpu.pipeline_mode<synchronous>, transform_indices = @transform_3, window_bounds = array<i64: 128, 128>}, {pipeline_mode = #tpu.pipeline_mode<synchronous>, transform_indices = @transform_4, window_bounds = array<i64: 1, 128>}, {pipeline_mode = #tpu.pipeline_mode<synchronous>, transform_indices = @transform_5, window_bounds = array<i64: 128, 128>}, {pipeline_mode = #tpu.pipeline_mode<synchronous>, transform_indices = @transform_6, window_bounds = array<i64: 1, 128>}, {transform_indices = @transform_7, window_bounds = array<i64: 8, 6>}]} {
    %c0 = arith.constant 0 : index
    %c0_0 = arith.constant 0 : index
    %0 = vector.load %arg1[%c0, %c0_0] : memref<8x561xf32, #tpu.memory_space<vmem>>, vector<8x561xf32>
    %c0_1 = arith.constant 0 : index
    %c0_2 = arith.constant 0 : index
    %1 = vector.load %arg2[%c0_1, %c0_2] : memref<561x128xf32, #tpu.memory_space<vmem>>, vector<561x128xf32>
    %cst = arith.constant dense<0.000000e+00> : vector<8x128xf32>
    %2 = tpu.matmul %0, %1, %cst {dimension_numbers = #tpu.dot_dimension_numbers<[1], [0], [0], [1], [0, 0, 1, 1], [], []>} : vector<8x561xf32>, vector<561x128xf32>, vector<8x128xf32> -> vector<8x128xf32>
    %c0_3 = arith.constant 0 : index
    %c0_4 = arith.constant 0 : index
    %3 = vector.load %arg3[%c0_3, %c0_4] : memref<1x128xf32, #tpu.memory_space<vmem>>, vector<1x128xf32>
    %4 = vector.broadcast %3 : vector<1x128xf32> to vector<8x128xf32>
    %5 = arith.addf %2, %4 : vector<8x128xf32>
    %cst_5 = arith.constant 0.000000e+00 : f32
    %6 = vector.broadcast %cst_5 : f32 to vector<8x128xf32>
    %7 = arith.maximumf %5, %6 : vector<8x128xf32>
    %c0_6 = arith.constant 0 : index
    %c0_7 = arith.constant 0 : index
    %8 = vector.load %arg4[%c0_6, %c0_7] : memref<128x128xf32, #tpu.memory_space<vmem>>, vector<128x128xf32>
    %cst_8 = arith.constant dense<0.000000e+00> : vector<8x128xf32>
    %9 = tpu.matmul %7, %8, %cst_8 {dimension_numbers = #tpu.dot_dimension_numbers<[1], [0], [0], [1], [0, 0, 1, 1], [], []>} : vector<8x128xf32>, vector<128x128xf32>, vector<8x128xf32> -> vector<8x128xf32>
    %c0_9 = arith.constant 0 : index
    %c0_10 = arith.constant 0 : index
    %10 = vector.load %arg5[%c0_9, %c0_10] : memref<1x128xf32, #tpu.memory_space<vmem>>, vector<1x128xf32>
    %11 = vector.broadcast %10 : vector<1x128xf32> to vector<8x128xf32>
    %12 = arith.addf %9, %11 : vector<8x128xf32>
    %cst_11 = arith.constant 0.000000e+00 : f32
    %13 = vector.broadcast %cst_11 : f32 to vector<8x128xf32>
    %14 = arith.maximumf %12, %13 : vector<8x128xf32>
    %c0_12 = arith.constant 0 : index
    %c0_13 = arith.constant 0 : index
    %15 = vector.load %arg6[%c0_12, %c0_13] : memref<128x128xf32, #tpu.memory_space<vmem>>, vector<128x128xf32>
    %cst_14 = arith.constant dense<0.000000e+00> : vector<8x128xf32>
    %16 = tpu.matmul %14, %15, %cst_14 {dimension_numbers = #tpu.dot_dimension_numbers<[1], [0], [0], [1], [0, 0, 1, 1], [], []>} : vector<8x128xf32>, vector<128x128xf32>, vector<8x128xf32> -> vector<8x128xf32>
    %c0_15 = arith.constant 0 : index
    %c0_16 = arith.constant 0 : index
    %17 = vector.load %arg7[%c0_15, %c0_16] : memref<1x128xf32, #tpu.memory_space<vmem>>, vector<1x128xf32>
    %18 = vector.broadcast %17 : vector<1x128xf32> to vector<8x128xf32>
    %19 = arith.addf %16, %18 : vector<8x128xf32>
    %20 = vector.extract_strided_slice %19 {offsets = [0, 0], sizes = [8, 6], strides = [1, 1]} : vector<8x128xf32> to vector<8x6xf32>
    %c0_17 = arith.constant 0 : index
    %c0_18 = arith.constant 0 : index
    %21 = vector.load %arg8[%c0_17, %c0_18] : memref<8x6xf32, #tpu.memory_space<vmem>>, vector<8x6xf32>
    tpu.vector_store %arg8[%c0_17, %c0_18], %20 {strides = array<i32>} : memref<8x6xf32, #tpu.memory_space<vmem>>, vector<8x6xf32>,
    return
  }
  func.func @transform_0(%arg0: i32) -> (i32, i32) {
    %c0_i32 = arith.constant 0 : i32
    %c0_i32_0 = arith.constant 0 : i32
    return %arg0, %c0_i32 : i32, i32
  }
  func.func @transform_1(%arg0: i32) -> (i32, i32) {
    %c0_i32 = arith.constant 0 : i32
    %c0_i32_0 = arith.constant 0 : i32
    %c0_i32_1 = arith.constant 0 : i32
    return %c0_i32, %c0_i32_0 : i32, i32
  }
  func.func @transform_2(%arg0: i32) -> (i32, i32) {
    %c0_i32 = arith.constant 0 : i32
    %c0_i32_0 = arith.constant 0 : i32
    %c0_i32_1 = arith.constant 0 : i32
    return %c0_i32, %c0_i32_0 : i32, i32
  }
  func.func @transform_3(%arg0: i32) -> (i32, i32) {
    %c0_i32 = arith.constant 0 : i32
    %c0_i32_0 = arith.constant 0 : i32
    %c0_i32_1 = arith.constant 0 : i32
    return %c0_i32, %c0_i32_0 : i32, i32
  }
  func.func @transform_4(%arg0: i32) -> (i32, i32) {
    %c0_i32 = arith.constant 0 : i32
    %c0_i32_0 = arith.constant 0 : i32
    %c0_i32_1 = arith.constant 0 : i32
    return %c0_i32, %c0_i32_0 : i32, i32
  }
  func.func @transform_5(%arg0: i32) -> (i32, i32) {
    %c0_i32 = arith.constant 0 : i32
    %c0_i32_0 = arith.constant 0 : i32
    %c0_i32_1 = arith.constant 0 : i32
    return %c0_i32, %c0_i32_0 : i32, i32
  }
  func.func @transform_6(%arg0: i32) -> (i32, i32) {
    %c0_i32 = arith.constant 0 : i32
    %c0_i32_0 = arith.constant 0 : i32
    %c0_i32_1 = arith.constant 0 : i32
    return %c0_i32, %c0_i32_0 : i32, i32
  }
  func.func @transform_7(%arg0: i32) -> (i32, i32) {
    %c0_i32 = arith.constant 0 : i32
    %c0_i32_0 = arith.constant 0 : i32
    return %arg0, %c0_i32 : i32, i32
  }
}

</mosaic_0001>

<bundles_post_ra>
// kernel: harfnn_forward.1
= control target key start
LH: loop header
LB: loop body
LE: loop exit
PB: predicated region body
PF: predicated region fallthrough
CT: control target
= control target key end

     0   :  { %12 = vsyncpa [#allocation3], 0  ;;  %s1191_s0 = inlined_call_operand.hbm [shape: f32[8,561], index: 0, kind: input, shape index: {}]   ;;  %s1192_s1 = inlined_call_operand.hbm [shape: f32[561,128], index: 1, kind: input, shape index: {}]   ;;  %s1193_s2 = inlined_call_operand.vmem [shape: f32[1,128], index: 2, kind: input, shape index: {}]   ;;  %s1194_s3 = inlined_call_operand.hbm [shape: f32[128,128], index: 3, kind: input, shape index: {}]   ;;  %s1195_s4 = inlined_call_operand.vmem [shape: f32[1,128], index: 4, kind: input, shape index: {}]   ;;  %s1196_s5 = inlined_call_operand.hbm [shape: f32[128,128], index: 5, kind: input, shape index: {}]   ;;  %s1197_s6 = inlined_call_operand.vmem [shape: f32[1,128], index: 6, kind: input, shape index: {}]   ;;  %s1198_s7 = inlined_call_operand.hbm [shape: f32[8,6], index: 7, kind: output, shape index: {}]  }
   0x1   :  { %13 = vsyncpa [#allocation6], 0 }
   0x2   :  { %14 = vsyncpa [#allocation9], 0 }
   0x3   :  { %15 = vsyncpa [#allocation4], 0  ;;  %s1041_s24 = smov [#allocation5]   ;;  %s923_s28 = scalar_lea.hbm %s1192_s1, 9088 }
   0x4   :  { %s31_s25 = sshll.u32 %s1041_s24, 4  ;;  %p924_p0 = scmp.ne.s32.totalorder %s1192_s1, %s923_s28  ;;  %s32_s25 = int_to_ptr.vmem [resolvable:$true] %s31_s25 }
   0x5   :  { %p927_p1 = scmp.lt.u32.totalorder %s923_s28, %s1192_s1 }
   0x7   :  { %p929_p2 = pnand %p927_p1, %p924_p0 }
   0x9   :  { %932 = shalt.err (!%p929_p2)
}
   0xa   :  { %s933_s10 = scalar_lea.vmem %s32_s25, 9088  ;;  %p938_p4 = scmp.lt.s32.totalorder %s32_s25, %s32_s25 }
   0xb   :  { %p934_p3 = scmp.ne.s32.totalorder %s32_s25, %s933_s10  ;;  %p939_p5 = scmp.lt.s32.totalorder %s933_s10, %s933_s10 }
   0xd   :  { %p940_p6 = por %p939_p5, %p938_p4 }
   0xf   :  { %p941_p7 = pnand %p940_p6, %p934_p3 }
  0x11   :  { %944 = shalt.err (!%p941_p7)
}
  0x12   :  { %s1042_s11 = smov 128   ;;  %s1043_s12 = smov 8  }
  0x13   :  { %37 = dma.hbm_to_vmem [thread:$0]  %s1192_s1, 9088, %s32_s25, [#allocation6], %s1042_s11, %s1042_s11, %s1043_s12  }
  0x14   :  { %s1044_s15 = smov [#allocation2]   ;;  %s1045_s17 = smov [#allocation7]  }
  0x15   :  { %s22_s16 = sshll.u32 %s1044_s15, 4  ;;  %s45_s18 = sshll.u32 %s1045_s17, 4  ;;  %s23_s16 = int_to_ptr.vmem [resolvable:$true] %s22_s16  ;;  %s46_s18 = int_to_ptr.vmem [resolvable:$true] %s45_s18 }
  0x16   :  { %s945_s21 = scalar_lea.hbm %s1191_s0, 640 }
  0x17   :  { %p946_p8 = scmp.ne.s32.totalorder %s1191_s0, %s945_s21  ;;  %p949_p9 = scmp.lt.u32.totalorder %s945_s21, %s1191_s0 }
  0x19   :  { %p951_p10 = pnand %p949_p9, %p946_p8 }
  0x1b   :  { %954 = shalt.err (!%p951_p10)
}
  0x1c   :  { %s955_s1 = scalar_lea.vmem %s23_s16, 640  ;;  %p960_p12 = scmp.lt.s32.totalorder %s23_s16, %s23_s16 }
  0x1d   :  { %p956_p11 = scmp.ne.s32.totalorder %s23_s16, %s955_s1  ;;  %p961_p13 = scmp.lt.s32.totalorder %s955_s1, %s955_s1 }
  0x1f   :  { %p962_p0 = por %p961_p13, %p960_p12 }
  0x21   :  { %p963_p1 = pnand %p962_p0, %p956_p11 }
  0x23   :  { %966 = shalt.err (!%p963_p1)
}
  0x24   :  { %25 = dma.hbm_to_vmem [thread:$0]  %s1191_s0, 640, %s23_s16, [#allocation3]  }
  0x25   :  { %s967_s30 = scalar_lea.hbm %s1194_s3, 2048 }
  0x26   :  { %p968_p2 = scmp.ne.s32.totalorder %s1194_s3, %s967_s30  ;;  %p971_p3 = scmp.lt.u32.totalorder %s967_s30, %s1194_s3 }
  0x28   :  { %p973_p4 = pnand %p971_p3, %p968_p2 }
  0x2a   :  { %976 = shalt.err (!%p973_p4)
}
  0x2b   :  { %s977_s14 = scalar_lea.vmem %s46_s18, 2048  ;;  %p982_p6 = scmp.lt.s32.totalorder %s46_s18, %s46_s18 }
  0x2c   :  { %p978_p5 = scmp.ne.s32.totalorder %s46_s18, %s977_s14  ;;  %p983_p7 = scmp.lt.s32.totalorder %s977_s14, %s977_s14 }
  0x2e   :  { %p984_p8 = por %p983_p7, %p982_p6 }
  0x30   :  { %p985_p9 = pnand %p984_p8, %p978_p5 }
  0x32   :  { %988 = shalt.err (!%p985_p9)
}
  0x33   :  { %51 = dma.hbm_to_vmem [thread:$0]  %s1194_s3, 2048, %s46_s18, [#allocation6], %s1042_s11, %s1042_s11, %s1043_s12  }
  0x34   :  { %s1046_s16 = smov [#allocation8]   ;;  %s989_s21 = scalar_lea.hbm %s1196_s5, 2048 }
  0x35   :  { %s59_s17 = sshll.u32 %s1046_s16, 4  ;;  %p990_p10 = scmp.ne.s32.totalorder %s1196_s5, %s989_s21  ;;  %s60_s17 = int_to_ptr.vmem [resolvable:$true] %s59_s17 }
  0x36   :  { %p993_p11 = scmp.lt.u32.totalorder %s989_s21, %s1196_s5 }
  0x38   :  { %p995_p12 = pnand %p993_p11, %p990_p10 }
  0x3a   :  { %998 = shalt.err (!%p995_p12)
}
  0x3b   :  { %s999_s1 = scalar_lea.vmem %s60_s17, 2048  ;;  %p1004_p0 = scmp.lt.s32.totalorder %s60_s17, %s60_s17 }
  0x3c   :  { %p1000_p13 = scmp.ne.s32.totalorder %s60_s17, %s999_s1  ;;  %p1005_p1 = scmp.lt.s32.totalorder %s999_s1, %s999_s1 }
  0x3e   :  { %p1006_p2 = por %p1005_p1, %p1004_p0 }
  0x40   :  { %p1007_p3 = pnand %p1006_p2, %p1000_p13 }
  0x42   :  { %1010 = shalt.err (!%p1007_p3)
}
  0x43   :  { %65 = dma.hbm_to_vmem [thread:$0]  %s1196_s5, 2048, %s60_s17, [#allocation9], %s1042_s11, %s1042_s11, %s1043_s12  }
  0x44   :  { %1033 = dma.done.wait [#allocation3], 640  }
  0x45   :  { %1034 = vsyncadd [#allocation3], 4294966656 }
  0x46   :  { %1035 = dma.done.wait [#allocation6], 11136  }
  0x47   :  { %1036 = vsyncadd [#allocation6], 4294956160 }
  0x48   :  { %1037 = dma.done.wait [#allocation9], 2048  }
  0x49   :  { %1038 = vsyncadd [#allocation9], 4294965248  ;;  %v101_v0 = vld [vmem:[#allocation5 + $0x80] sm:$0xff]  ;;  %v102_v1 = vld [vmem:[#allocation5 + $0x88] sm:$0xff]  ;;  %vm1048_vm0 = vmmov 0   ;;  %vm167_vm1 = vcmask 1040384  }
  0x4a   :  { %v85_v2 = vld [vmem:[#allocation5] sm:$0xff]  ;;  %v792_v3 = vpack.c.bf16 %v102_v1, %v101_v0  ;;  %v86_v4 = vld [vmem:[#allocation5 + $0x8] sm:$0xff]  ;;  %v103_v11 = vld [vmem:[#allocation5 + $0x90] sm:$0xff]  ;;  %vm163_vm2 = vcmask 400384   ;;  %s1050_s28 = smov [#allocation10]   ;;  %vm569_vm3 = vcmask 48128  }
  0x4b   :  { %v133_v5 = vld [vmem:[#allocation5 + $0x180] sm:$0xff]  ;;  %v134_v6 = vld [vmem:[#allocation5 + $0x188] sm:$0xff]  ;;  %v794_v7 = vpack.c.bf16 %v86_v4, %v85_v2  ;;  %v104_v13 = vld [vmem:[#allocation5 + $0x98] sm:$0xff]  ;;  %s577_s29 = sshll.u32 %s1050_s28, 4  ;;  %s578_s29 = int_to_ptr.vmem [resolvable:$true] %s577_s29 }
  0x4c   :  { %v824_v8 = vpack.c.bf16 %v134_v6, %v133_v5  ;;  %v117_v9 = vld [vmem:[#allocation5 + $0x100] sm:$0xff]  ;;  %v118_v10 = vld [vmem:[#allocation5 + $0x108] sm:$0xff]  ;;  %793 = vmatprep.subr.bf16.mxu0 %v792_v3  ;;  %v87_v14 = vld [vmem:[#allocation5 + $0x10] sm:$0xff]  ;;  %v796_v16 = vpack.c.bf16 %v104_v13, %v103_v11  ;;  %s1011_s30 = scalar_lea.vmem %s578_s29, 128  ;;  %p1016_p5 = scmp.lt.s32.totalorder %s578_s29, %s578_s29 }
  0x4d   :  { %v826_v12 = vpack.c.bf16 %v118_v10, %v117_v9  ;;  %v88_v15 = vld [vmem:[#allocation5 + $0x18] sm:$0xff]  ;;  %795 = vmatpush3.bf16.msra.mxu0 %v794_v7  ;;  %v135_v18 = vld [vmem:[#allocation5 + $0x190] sm:$0xff]  ;;  %v105_v23 = vld [vmem:[#allocation5 + $0xa0] sm:$0xff]  ;;  %p1012_p4 = scmp.ne.s32.totalorder %s578_s29, %s1011_s30  ;;  %p1017_p6 = scmp.lt.s32.totalorder %s1011_s30, %s1011_s30 }
  0x4e   :  { %825 = vmatprep.subr.bf16.mxu1 %v824_v8  ;;  %v798_v17 = vpack.c.bf16 %v88_v15, %v87_v14  ;;  %v136_v19 = vld [vmem:[#allocation5 + $0x198] sm:$0xff]  ;;  %v119_v20 = vld [vmem:[#allocation5 + $0x110] sm:$0xff]  ;;  %v106_v24 = vld [vmem:[#allocation5 + $0xa8] sm:$0xff]  ;;  %797 = vmatprep.subr.bf16.mxu0 %v796_v16 }
  0x4f   :  { %827 = vmatpush3.bf16.msra.mxu1 %v826_v12  ;;  %v828_v21 = vpack.c.bf16 %v136_v19, %v135_v18  ;;  %v120_v22 = vld [vmem:[#allocation5 + $0x118] sm:$0xff]  ;;  %v800_v26 = vpack.c.bf16 %v106_v24, %v105_v23  ;;  %v89_v27 = vld [vmem:[#allocation5 + $0x20] sm:$0xff]  ;;  %v90_v28 = vld [vmem:[#allocation5 + $0x28] sm:$0xff]  ;;  %p1018_p7 = por %p1017_p6, %p1016_p5 }
  0x50   :  { %v830_v25 = vpack.c.bf16 %v120_v22, %v119_v20  ;;  %v137_v29 = vld [vmem:[#allocation5 + $0x1a0] sm:$0xff]  ;;  %v138_v30 = vld [vmem:[#allocation5 + $0x1a8] sm:$0xff]  ;;  %v802_v33 = vpack.c.bf16 %v90_v28, %v89_v27  ;;  %v107_v35 = vld [vmem:[#allocation5 + $0xb0] sm:$0xff] }
  0x51   :  { %829 = vmatprep.subr.bf16.mxu1 %v828_v21  ;;  %v121_v31 = vld [vmem:[#allocation5 + $0x120] sm:$0xff]  ;;  %v122_v32 = vld [vmem:[#allocation5 + $0x128] sm:$0xff]  ;;  %799 = vmatpush3.bf16.msra.mxu0 %v798_v17  ;;  %v832_v34 = vpack.c.bf16 %v138_v30, %v137_v29  ;;  %v108_v36 = vld [vmem:[#allocation5 + $0xb8] sm:$0xff]  ;;  %p1019_p8 = pnand %p1018_p7, %p1012_p4 }
  0x52   :  { %v91_v37 = vld [vmem:[#allocation5 + $0x30] sm:$0xff]  ;;  %801 = vmatprep.subr.bf16.mxu0 %v800_v26  ;;  %v834_v38 = vpack.c.bf16 %v122_v32, %v121_v31  ;;  %v804_v39 = vpack.c.bf16 %v108_v36, %v107_v35  ;;  %v92_v40 = vld [vmem:[#allocation5 + $0x38] sm:$0xff]  ;;  %v109_v46 = vld [vmem:[#allocation5 + $0xc0] sm:$0xff] }
  0x53   :  { %831 = vmatpush3.bf16.msra.mxu1 %v830_v25  ;;  %v139_v41 = vld [vmem:[#allocation5 + $0x1b0] sm:$0xff]  ;;  %v140_v42 = vld [vmem:[#allocation5 + $0x1b8] sm:$0xff]  ;;  %v110_v47 = vld [vmem:[#allocation5 + $0xc8] sm:$0xff]  ;;  %v806_v48 = vpack.c.bf16 %v92_v40, %v91_v37  ;;  %v1047_v40 = vmov 0.0|0.0  }
  0x54   :  { %833 = vmatprep.subr.bf16.mxu1 %v832_v34  ;;  %v836_v43 = vpack.c.bf16 %v140_v42, %v139_v41  ;;  %v123_v44 = vld [vmem:[#allocation5 + $0x130] sm:$0xff]  ;;  %v124_v45 = vld [vmem:[#allocation5 + $0x138] sm:$0xff]  ;;  %v141_v49 = vld [vmem:[#allocation5 + $0x1c0] sm:$0xff]  ;;  %v808_v52 = vpack.c.bf16 %v110_v47, %v109_v46 }
  0x55   :  { %803 = vmatpush3.bf16.msra.mxu0 %v802_v33  ;;  %v142_v50 = vld [vmem:[#allocation5 + $0x1c8] sm:$0xff]  ;;  %v838_v51 = vpack.c.bf16 %v124_v45, %v123_v44  ;;  %v93_v53 = vld [vmem:[#allocation5 + $0x40] sm:$0xff]  ;;  %v111_v58 = vld [vmem:[#allocation5 + $0xd0] sm:$0xff] }
  0x56   :  { %805 = vmatprep.subr.bf16.mxu0 %v804_v39  ;;  %v94_v54 = vld [vmem:[#allocation5 + $0x48] sm:$0xff]  ;;  %v125_v55 = vld [vmem:[#allocation5 + $0x140] sm:$0xff]  ;;  %v840_v56 = vpack.c.bf16 %v142_v50, %v141_v49  ;;  %v112_v59 = vld [vmem:[#allocation5 + $0xd8] sm:$0xff]  ;;  %v1049_v50 = vmov 0.0  }
  0x57   :  { %835 = vmatpush3.bf16.msra.mxu1 %v834_v38  ;;  %v126_v57 = vld [vmem:[#allocation5 + $0x148] sm:$0xff]  ;;  %v143_v60 = vld [vmem:[#allocation5 + $0x1d0] sm:$0xff]  ;;  %v144_v61 = vld [vmem:[#allocation5 + $0x1d8] sm:$0xff]  ;;  %v810_v62 = vpack.c.bf16 %v94_v54, %v93_v53  ;;  %v812_v0 = vpack.c.bf16 %v112_v59, %v111_v58 }
  0x58   :  { %837 = vmatprep.subr.bf16.mxu1 %v836_v43  ;;  %v842_v63 = vpack.c.bf16 %v126_v57, %v125_v55  ;;  %v95_v1 = vld [vmem:[#allocation5 + $0x50] sm:$0xff]  ;;  %v96_v2 = vld [vmem:[#allocation5 + $0x58] sm:$0xff]  ;;  %v844_v4 = vpack.c.bf16 %v144_v61, %v143_v60  ;;  %v113_v6 = vld [vmem:[#allocation5 + $0xe0] sm:$0xff] }
  0x59   :  { %807 = vmatpush3.bf16.msra.mxu0 %v806_v48  ;;  %v127_v3 = vld [vmem:[#allocation5 + $0x150] sm:$0xff]  ;;  %v128_v5 = vld [vmem:[#allocation5 + $0x158] sm:$0xff]  ;;  %v114_v7 = vld [vmem:[#allocation5 + $0xe8] sm:$0xff]  ;;  %v814_v10 = vpack.c.bf16 %v96_v2, %v95_v1 }
  0x5a   :  { %809 = vmatprep.subr.bf16.mxu0 %v808_v52  ;;  %v145_v8 = vld [vmem:[#allocation5 + $0x1e0] sm:$0xff]  ;;  %v146_v9 = vld [vmem:[#allocation5 + $0x1e8] sm:$0xff]  ;;  %v846_v13 = vpack.c.bf16 %v128_v5, %v127_v3  ;;  %v816_v14 = vpack.c.bf16 %v114_v7, %v113_v6  ;;  %v115_v19 = vld [vmem:[#allocation5 + $0xf0] sm:$0xff] }
  0x5b   :  { %839 = vmatpush3.bf16.msra.mxu1 %v838_v51  ;;  %v97_v11 = vld [vmem:[#allocation5 + $0x60] sm:$0xff]  ;;  %v98_v15 = vld [vmem:[#allocation5 + $0x68] sm:$0xff]  ;;  %v848_v18 = vpack.c.bf16 %v146_v9, %v145_v8  ;;  %v116_v20 = vld [vmem:[#allocation5 + $0xf8] sm:$0xff] }
  0x5c   :  { %841 = vmatprep.subr.bf16.mxu1 %v840_v56  ;;  %v81_v12 = vld [vmem:[#allocation2 + $0x8] sm:$0xff]  ;;  %v130_v17 = vld [vmem:[#allocation5 + $0x168] sm:$0xff]  ;;  %v83_v21 = vld [vmem:[#allocation2 + $0x18] sm:$0xff]  ;;  %v818_v24 = vpack.c.bf16 %v98_v15, %v97_v11  ;;  %v820_v26 = vpack.c.bf16 %v116_v20, %v115_v19 }
  0x5d   :  { %811 = vmatpush3.bf16.msra.mxu0 %v810_v62  ;;  %v129_v16 = vld [vmem:[#allocation5 + $0x160] sm:$0xff]  ;;  %235 = vmatprep.mubr.f32.mxu0 %v81_v12  ;;  %v147_v22 = vld [vmem:[#allocation5 + $0x1f0] sm:$0xff]  ;;  %v148_v23 = vld [vmem:[#allocation5 + $0x1f8] sm:$0xff] }
  0x5e   :  { %813 = vmatprep.subr.bf16.mxu0 %v812_v0  ;;  %305 = vmatprep.mubr.f32.mxu1 %v83_v21  ;;  %v850_v25 = vpack.c.bf16 %v130_v17, %v129_v16  ;;  %v99_v27 = vld [vmem:[#allocation5 + $0x70] sm:$0xff]  ;;  %v100_v28 = vld [vmem:[#allocation5 + $0x78] sm:$0xff]  ;;  %v852_v29 = vpack.c.bf16 %v148_v23, %v147_v22  ;;  %v149_v34 = vld [vmem:[#allocation5 + $0x200] sm:$0xff] }
  0x5f   :  { %843 = vmatpush3.bf16.msra.mxu1 %v842_v63  ;;  %v131_v30 = vld [vmem:[#allocation5 + $0x170] sm:$0xff]  ;;  %v132_v31 = vld [vmem:[#allocation5 + $0x178] sm:$0xff]  ;;  %v822_v32 = vpack.c.bf16 %v100_v28, %v99_v27  ;;  %v150_v35 = vld [vmem:[#allocation5 + $0x208] sm:$0xff] }
  0x60   :  { %845 = vmatprep.subr.bf16.mxu1 %v844_v4  ;;  %v854_v33 = vpack.c.bf16 %v132_v31, %v131_v30  ;;  %v382_v36 = vld [vmem:[#allocation7] sm:$0xff]  ;;  %v383_v37 = vld [vmem:[#allocation7 + $0x8] sm:$0xff]  ;;  %v857_v39 = vpack.c.bf16 %v150_v35, %v149_v34  ;;  %v82_v41 = vld [vmem:[#allocation2 + $0x10] sm:$0xff] }
  0x61   :  { %815 = vmatpush3.bf16.msra.mxu0 %v814_v10  ;;  %v80_v38 = vld [vmem:[#allocation2] sm:$0xff]  ;;  %v151_v42 = vld [vmem:[#allocation5 + $0x210] sm:$0xff]  ;;  %v866_v44 = vpack.c.bf16 %v383_v37, %v382_v36  ;;  %v384_v45 = vld [vmem:[#allocation7 + $0x10] sm:$0xff] }
  0x62   :  { %817 = vmatprep.subr.bf16.mxu0 %v816_v14  ;;  %v152_v43 = vld [vmem:[#allocation5 + $0x218] sm:$0xff]  ;;  %v385_v46 = vld [vmem:[#allocation7 + $0x18] sm:$0xff]  ;;  %v153_v48 = vld [vmem:[#allocation5 + $0x220] sm:$0xff] }
  0x63   :  { %847 = vmatpush3.bf16.msra.mxu1 %v846_v13  ;;  %v860_v47 = vpack.c.bf16 %v152_v43, %v151_v42  ;;  %v154_v49 = vld [vmem:[#allocation5 + $0x228] sm:$0xff]  ;;  %v869_v51 = vpack.c.bf16 %v385_v46, %v384_v45  ;;  %v386_v52 = vld [vmem:[#allocation7 + $0x20] sm:$0xff]  ;;  %v387_v53 = vld [vmem:[#allocation7 + $0x28] sm:$0xff] }
  0x64   :  { %849 = vmatprep.subr.bf16.mxu1 %v848_v18  ;;  %v863_v54 = vpack.c.bf16 %v154_v49, %v153_v48  ;;  %v872_v55 = vpack.c.bf16 %v387_v53, %v386_v52  ;;  %v155_v56 = vld [vmem:[#allocation5 + $0x230] sm:$0x1]  ;;  %v84_v57 = vld [vmem:[#allocation2 + $0x20] sm:$0xff]  ;;  %v388_v58 = vld [vmem:[#allocation7 + $0x30] sm:$0xff] }
  0x65   :  { %819 = vmatpush3.bf16.msra.mxu0 %v818_v24  ;;  %v389_v59 = vld [vmem:[#allocation7 + $0x38] sm:$0xff]  ;;  %v390_v61 = vld [vmem:[#allocation7 + $0x40] sm:$0xff]  ;;  %v391_v62 = vld [vmem:[#allocation7 + $0x48] sm:$0xff] }
  0x66   :  { %821 = vmatprep.subr.bf16.mxu0 %v820_v26  ;;  %v875_v60 = vpack.c.bf16 %v389_v59, %v388_v58  ;;  %v878_v63 = vpack.c.bf16 %v391_v62, %v390_v61  ;;  %v392_v0 = vld [vmem:[#allocation7 + $0x50] sm:$0xff]  ;;  %v393_v1 = vld [vmem:[#allocation7 + $0x58] sm:$0xff]  ;;  %v394_v3 = vld [vmem:[#allocation7 + $0x60] sm:$0xff] }
  0x67   :  { %851 = vmatpush3.bf16.msra.mxu1 %v850_v25  ;;  %v881_v2 = vpack.c.bf16 %v393_v1, %v392_v0  ;;  %v395_v4 = vld [vmem:[#allocation7 + $0x68] sm:$0xff]  ;;  %v396_v6 = vld [vmem:[#allocation7 + $0x70] sm:$0xff]  ;;  %v397_v7 = vld [vmem:[#allocation7 + $0x78] sm:$0xff] }
  0x68   :  { %853 = vmatprep.subr.bf16.mxu1 %v852_v29  ;;  %v884_v5 = vpack.c.bf16 %v395_v4, %v394_v3  ;;  %v887_v8 = vpack.c.bf16 %v397_v7, %v396_v6  ;;  %v476_v9 = vld [vmem:[#allocation8] sm:$0xff]  ;;  %v477_v10 = vld [vmem:[#allocation8 + $0x8] sm:$0xff]  ;;  %v478_v11 = vld [vmem:[#allocation8 + $0x10] sm:$0xff] }
  0x69   :  { %823 = vmatpush3.bf16.msra.mxu0 %v822_v32  ;;  %v890_v12 = vpack.c.bf16 %v477_v10, %v476_v9  ;;  %v479_v13 = vld [vmem:[#allocation8 + $0x18] sm:$0xff]  ;;  %v480_v15 = vld [vmem:[#allocation8 + $0x20] sm:$0xff]  ;;  %v481_v16 = vld [vmem:[#allocation8 + $0x28] sm:$0xff] }
  0x6a   :  { %856 = vmatprep.subr.bf16.mxu0 %v1047_v40  ;;  %v893_v14 = vpack.c.bf16 %v479_v13, %v478_v11  ;;  %v896_v17 = vpack.c.bf16 %v481_v16, %v480_v15  ;;  %v482_v18 = vld [vmem:[#allocation8 + $0x30] sm:$0xff]  ;;  %v483_v19 = vld [vmem:[#allocation8 + $0x38] sm:$0xff]  ;;  %v484_v21 = vld [vmem:[#allocation8 + $0x40] sm:$0xff] }
  0x6b   :  { %855 = vmatpush3.bf16.msra.mxu1 %v854_v33  ;;  %v899_v20 = vpack.c.bf16 %v483_v19, %v482_v18  ;;  %v485_v22 = vld [vmem:[#allocation8 + $0x48] sm:$0xff]  ;;  %v486_v24 = vld [vmem:[#allocation8 + $0x50] sm:$0xff]  ;;  %v487_v25 = vld [vmem:[#allocation8 + $0x58] sm:$0xff] }
  0x6c   :  { %865 = vmatprep.subr.bf16.mxu1 %v1047_v40  ;;  %236 = vmatmul.mubr.f32.vlgmr.msra.gmra.mrb[0].mxu0 %v80_v38  ;;  %v902_v23 = vpack.c.bf16 %v485_v22, %v484_v21  ;;  %v905_v26 = vpack.c.bf16 %v487_v25, %v486_v24  ;;  %v488_v27 = vld [vmem:[#allocation8 + $0x60] sm:$0xff]  ;;  %v489_v28 = vld [vmem:[#allocation8 + $0x68] sm:$0xff]  ;;  %v491_v45 = vld [vmem:[#allocation8 + $0x78] sm:$0xff] }
  0x6d   :  { %858 = vmatpush3.bf16.msra.mxu0 %v857_v39  ;;  %719 = vmatprep.mubr.msk.f32.mxu0 %vm1048_vm0, %v1049_v50  ;;  %v908_v29 = vpack.c.bf16 %v489_v28, %v488_v27  ;;  %v588_v31 = vld [vmem:[%s1193_s2] ss:$0 sm:$0xff] }
  0x6e   :  { %306 = vmatmul.mubr.f32.vlgmr.msra.gmra.mrb[0].mxu1 %v82_v41  ;;  %859 = vmatprep.subr.bf16.mxu0 %v1047_v40  ;;  %v591_v46 = vld [vmem:[%s1195_s4] ss:$0 sm:$0xff] }
  0x6f   :  { %867 = vmatpush3.bf16.msra.mxu1 %v866_v44  ;;  %754 = vmatprep.mubr.msk.f32.mxu1 %vm1048_vm0, %v1049_v50  ;;  %v490_v44 = vld [vmem:[#allocation8 + $0x70] sm:$0xff] }
  0x70   :  { %868 = vmatprep.subr.bf16.mxu1 %v1047_v40 }
  0x71   :  { %861 = vmatpush3.bf16.msra.mxu0 %v860_v47 }
  0x72   :  { %862 = vmatprep.subr.bf16.mxu0 %v1047_v40 }
  0x73   :  { %870 = vmatpush3.bf16.msra.mxu1 %v869_v51  ;;  %v592_v51 = vld [vmem:[%s1197_s6] ss:$0 sm:$0xff] }
  0x74   :  { %871 = vmatprep.subr.bf16.mxu1 %v1047_v40 }
  0x75   :  { %864 = vmatpush3.bf16.msra.mxu0 %v863_v54 }
  0x76   :  { %717 = vmatprep.subr.mxu0 %v1049_v50 }
  0x77   :  { %873 = vmatpush3.bf16.msra.mxu1 %v872_v55 }
  0x78   :  { %874 = vmatprep.subr.bf16.mxu1 %v1047_v40 }
  0x79   :  { %718 = vmatpush3.msk.msra.mxu0 %vm167_vm1, %v155_v56 }
  0x7a   :  { %720 = vmatmul.mubr.msk.f32.vlgmr.msra.gmra.mrb[2].mxu0 %vm163_vm2, %v84_v57  ;;  %889 = vmatprep.subr.bf16.mxu0 %v1047_v40 }
  0x7b   :  { %789 = vmatprep.mubr.msk.f32.mxu0 %vm1048_vm0, %v1049_v50  ;;  %876 = vmatpush3.bf16.msra.mxu1 %v875_v60 }
  0x7c   :  { %877 = vmatprep.subr.bf16.mxu1 %v1047_v40  ;;  %891 = vmatpush3.bf16.msra.mxu0 %v890_v12 }
  0x7d   :  { %892 = vmatprep.subr.bf16.mxu0 %v1047_v40 }
  0x7f   :  { %879 = vmatpush3.bf16.msra.mxu1 %v878_v63 }
  0x80   :  { %880 = vmatprep.subr.bf16.mxu1 %v1047_v40  ;;  %894 = vmatpush3.bf16.msra.mxu0 %v893_v14 }
  0x81   :  { %895 = vmatprep.subr.bf16.mxu0 %v1047_v40 }
  0x83   :  { %882 = vmatpush3.bf16.msra.mxu1 %v881_v2 }
  0x84   :  { %883 = vmatprep.subr.bf16.mxu1 %v1047_v40  ;;  %897 = vmatpush3.bf16.msra.mxu0 %v896_v17 }
  0x85   :  { %898 = vmatprep.subr.bf16.mxu0 %v1047_v40 }
  0x87   :  { %885 = vmatpush3.bf16.msra.mxu1 %v884_v5 }
  0x88   :  { %886 = vmatprep.subr.bf16.mxu1 %v1047_v40  ;;  %900 = vmatpush3.bf16.msra.mxu0 %v899_v20 }
  0x89   :  { %901 = vmatprep.subr.bf16.mxu0 %v1047_v40 }
  0x8b   :  { %888 = vmatpush3.bf16.msra.mxu1 %v887_v8 }
  0x8c   :  { %903 = vmatpush3.bf16.msra.mxu0 %v902_v23 }
  0x8d   :  { %904 = vmatprep.subr.bf16.mxu0 %v1047_v40 }
  0x90   :  { %906 = vmatpush3.bf16.msra.mxu0 %v905_v26 }
  0x91   :  { %907 = vmatprep.subr.bf16.mxu0 %v1047_v40 }
  0x94   :  { %909 = vmatpush3.bf16.msra.mxu0 %v908_v29 }
  0x95   :  { %910 = vmatprep.subr.bf16.mxu0 %v1047_v40  ;;  %v911_v40 = vpack.c.bf16 %v491_v45, %v490_v44 }
  0x98   :  { %912 = vmatpush3.bf16.msra.mxu0 %v911_v40 }
 0x13f   :  { %v625_v30 = vpop.f32.mrb[0].mxu0 }
 0x140   :  { %v626_v32 = vpop.f32.mrb[1].mxu0 }
 0x141   :  { %v660_v33 = vpop.f32.mrb[0].mxu1  ;;  %v627_v34 = vadd.f32 %v626_v32, %v625_v30 }
 0x142   :  { %v661_v35 = vpop.f32.mrb[1].mxu1 }
 0x143   :  { %v662_v36 = vadd.f32 %v661_v35, %v660_v33  ;;  %v238_v37 = vadd.f32 %v627_v34, %v588_v31 }
 0x145   :  { %v308_v38 = vadd.f32 %v662_v36, %v238_v37 }
 0x14d   :  { %v377_v39 = vpop.f32.mrb[2].mxu0 }
 0x14e   :  { %v378_v41 = vadd.f32 %v377_v39, %v308_v38  ;;  %v721_v42 = vpop.f32.mrb[3].mxu0 }
 0x150   :  { %v381_v43 = vmax.f32 %v378_v41, 0.0 }
 0x152   :  { %755 = vmatmul.mubr.f32.vlgmr.msra.gmra.mrb[2].mxu1 %v381_v43 }
 0x225   :  { %v471_v47 = vpop.f32.mrb[2].mxu1 }
 0x226   :  { %v472_v48 = vadd.f32 %v591_v46, %v471_v47  ;;  %v756_v49 = vpop.f32.mrb[3].mxu1 }
 0x228   :  { %v475_v50 = vmax.f32 %v472_v48, 0.0 }
 0x22a   :  { %790 = vmatmul.mubr.f32.vlgmr.msra.gmra.mrb[4].mxu0 %v475_v50 }
 0x2fd   :  { %v565_v52 = vpop.f32.mrb[4].mxu0 }
 0x2fe   :  { %v566_v53 = vadd.f32 %v592_v51, %v565_v52  ;;  %v791_v54 = vpop.f32.mrb[5].mxu0 }
 0x300   :  { %570 = vst.msk [vmem:[#allocation10] sm:$0xff] %vm569_vm3, %v566_v53 }
 0x301   :  { %1022 = shalt.err (!%p1019_p8)
}
 0x302   :  { %s1023_s9 = scalar_lea.hbm %s1198_s7, 128 }
 0x303   :  { %p1024_p9 = scmp.ne.s32.totalorder %s1198_s7, %s1023_s9  ;;  %p1027_p10 = scmp.lt.u32.totalorder %s1023_s9, %s1198_s7 }
 0x305   :  { %p1029_p11 = pnand %p1027_p10, %p1024_p9 }
 0x307   :  { %1032 = shalt.err (!%p1029_p11)
}
 0x308   :  { %580 = dma.vmem_to_hbm [thread:$0]  %s578_s29, 128, %s1198_s7, [#allocation4]  }
 0x309   :  { %1039 = dma.done.wait [#allocation4], 128  }
 0x30a   :  { %1040 = vsyncadd [#allocation4], 4294967168 }
 0x30b   :  { %584 = vsyncpa [#allocation3], 1 }
 0x30c   :  { %585 = vsyncpa [#allocation6], 1 }
 0x30d   :  { %586 = vsyncpa [#allocation9], 1 }
 0x30e   :  { %587 = vsyncpa [#allocation4], 1 }

</bundles_post_ra>
